<compile_context>
chip_gen: v5e
topology: v5e:2x2
jax: 0.10.0
libtpu: 0.0.40
codegen_flags: <defaults>
</compile_context>

<pallas_src>
import jax
import jax.numpy as jnp
from jax import lax
from jax.experimental import pallas as pl
from jax.experimental.pallas import tpu as pltpu


def _round_up(x, m):
    return ((x + m - 1) // m) * m


def _cdiv(a, b):
    return (a + b - 1) // b


_LANE = 128
_MAX_TILE_COLS = 2048                    # big tiles amortize grid-step overhead
_MIN_GRID_STEPS = 8                      # >= 4 steps per v7x TensorCore
_TILE_VMEM_BUDGET = 28 * 1024 * 1024     # budget for the pipelined tiles
_VMEM_LIMIT_CAP = 48 * 1024 * 1024       # stay well under v7x 64 MiB physical


def _tile_vmem_bytes(c, e, t_hw):
    """VMEM footprint of the pipelined tiles (everything conservatively
    counted double-buffered; weight/bias are actually revisited-resident)."""
    x_blk = c * t_hw * 4          # f32 input tile
    o_blk = t_hw * e * 4          # f32 output tile
    w_blk = c * e * 2             # bf16 weight
    b_blk = max(e, _LANE) * 4     # f32 bias row
    return 2 * (x_blk + o_blk + w_blk + b_blk)


def _choose_hw_tile(hw, n_batch, c, e):
    """Tile of the H*W (lane) axis: multiple of 128 (or the full extent when
    HW <= 128), as big as possible subject to (a) the VMEM budget and
    (b) leaving >= _MIN_GRID_STEPS grid steps for pipelining / megacore."""
    if hw <= _LANE:
        return hw
    t = min(_MAX_TILE_COLS, _round_up(hw, _LANE))
    while t > _LANE and _tile_vmem_bytes(c, e, t) > _TILE_VMEM_BUDGET:
        t -= _LANE
    while t > _LANE and n_batch * _cdiv(hw, t) < _MIN_GRID_STEPS:
        t -= _LANE
    return t


# ----------------------------------------------------------------------------
# Fused kernel: (C, t_hw) block from the NCHW layout  x  (C, E) weight
#               -> (t_hw, E) output tile  (transpose + cast + matmul fused)
# ----------------------------------------------------------------------------
def _fused_proj_kernel(x_ref, w_ref, b_ref, o_ref):
    # x_ref: (C, t_hw) f32, read straight from the NCHW layout (batch squeezed)
    # w_ref: (C, E)    bf16, resident across the grid (constant index_map)
    # b_ref: (1, E)    f32
    # o_ref: (t_hw, E) f32
    x = x_ref[...].astype(jnp.bfloat16)              # in-register cast (VPU)
    acc = lax.dot_general(                           # transposed-LHS MXU matmul
        x, w_ref[...],
        dimension_numbers=(((0,), (0,)), ((), ())),  # contract C of both
        preferred_element_type=jnp.float32)          # (t_hw, E) f32 accumulate
    o_ref[...] = (acc + b_ref[...]).astype(o_ref.dtype)


def mlp_forward(x_nchw, w, b):
    """SegFormer MLP / Linear-Embedding forward.

    x_nchw: (N, C, H, W) float; w: (C, E) (== torch nn.Linear weight.T);
    b: (E,).  Returns (N, H*W, E) f32 = x.flatten(2).transpose(1, 2) @ w + b.
    """
    N, C, H, W = x_nchw.shape
    Cw, E = w.shape
    assert C == Cw and b.shape == (E,)
    HW = H * W

    x3 = x_nchw.reshape(N, C, HW)                    # metadata-only reshape
    w_bf = w.astype(jnp.bfloat16)                    # tiny parameter cast
    b2 = b.reshape(1, E).astype(jnp.float32)

    t_hw = _choose_hw_tile(HW, N, C, E)
    grid = (N, pl.cdiv(HW, t_hw))

    est = _tile_vmem_bytes(C, E, t_hw)
    vmem_limit = min(_VMEM_LIMIT_CAP,
                     max(32 * 1024 * 1024, int(est * 1.5)))

    out = pl.pallas_call(
        _fused_proj_kernel,
        out_shape=jax.ShapeDtypeStruct((N, HW, E), jnp.float32),
        grid=grid,
        in_specs=[
            # x block straight from NCHW: batch dim squeezed, full C on
            # sublanes, t_hw on lanes (always 128-lane dense loads).
            pl.BlockSpec((None, C, t_hw), lambda n, i: (n, 0, i)),
            # Weight / bias: constant index_map -> fetched once, kept resident.
            pl.BlockSpec((C, E), lambda n, i: (0, 0)),
            pl.BlockSpec((1, E), lambda n, i: (0, 0)),
        ],
        out_specs=pl.BlockSpec((None, t_hw, E), lambda n, i: (n, i, 0)),
        compiler_params=pltpu.CompilerParams(
            dimension_semantics=("parallel", "parallel"),
            vmem_limit_bytes=vmem_limit),
    )(x3, w_bf, b2)
    return out


# ----------------------------------------------------------------------------
# Self-test
# ----------------------------------------------------------------------------
if __name__ == "__main__":
    key = jax.random.PRNGKey(0)
    kx, kw, kb = jax.random.split(key, 3)

    # Small config (E < 128 masked-store path): N=2, C=32, 16x16, E=32.
    N, C, H, W, E = 2, 32, 16, 16, 32
    x = jax.random.normal(kx, (N, C, H, W), jnp.float32)
    w = (0.1 * jax.random.normal(kw, (C, E))).astype(jnp.float32)
    b = (0.1 * jax.random.normal(kb, (E,))).astype(jnp.float32)

    fwd = jax.jit(mlp_forward)
    out = jax.block_until_ready(fwd(x, w, b))
    assert out.shape == (N, H * W, E), out.shape

    # Reference: exact module semantics in f32 (tolerance covers bf16 MXU feed)
    ref = jnp.transpose(x.reshape(N, C, H * W), (0, 2, 1)) @ w + b
    assert jnp.allclose(out, ref, atol=2e-2, rtol=2e-2), "mismatch vs reference"

    # SegFormer-like stage (E >= 128): exercises the lane-dense output path.
    N2, C2, H2, W2, E2 = 1, 64, 16, 16, 256
    x2 = jax.random.normal(kx, (N2, C2, H2, W2), jnp.float32)
    w2 = (0.1 * jax.random.normal(kw, (C2, E2))).astype(jnp.float32)
    b2 = (0.1 * jax.random.normal(kb, (E2,))).astype(jnp.float32)
    out2 = jax.block_until_ready(jax.jit(mlp_forward)(x2, w2, b2))
    ref2 = jnp.transpose(x2.reshape(N2, C2, H2 * W2), (0, 2, 1)) @ w2 + b2
    assert out2.shape == (N2, H2 * W2, E2)
    assert jnp.allclose(out2, ref2, atol=2e-2, rtol=2e-2), "mismatch (E>=128)"

    print("KERNEL_OK")
</pallas_src>

<mosaic_0001>
module attributes {stable_mosaic.version = 11 : i64} {
  func.func @_fused_proj_kernel(%arg0: i32, %arg1: i32, %arg2: memref<1x32x128xf32, #tpu.memory_space<vmem>>, %arg3: memref<32x32xbf16, #tpu.memory_space<vmem>>, %arg4: memref<1x32xf32, #tpu.memory_space<vmem>>, %arg5: memref<1x128x32xf32, #tpu.memory_space<vmem>>) attributes {dimension_semantics = [#tpu.dimension_semantics<parallel>, #tpu.dimension_semantics<parallel>], iteration_bounds = array<i64: 2, 2>, scalar_prefetch = 0 : i64, scratch_operands = 0 : i64, tpu.core_type = #tpu.core_type<tc>, window_params = [{transform_indices = @transform_0, window_bounds = array<i64: 1, 32, 128>}, {pipeline_mode = #tpu.pipeline_mode<synchronous>, transform_indices = @transform_1, window_bounds = array<i64: 32, 32>}, {pipeline_mode = #tpu.pipeline_mode<synchronous>, transform_indices = @transform_2, window_bounds = array<i64: 1, 32>}, {transform_indices = @transform_3, window_bounds = array<i64: 1, 128, 32>}]} {
    %c0 = arith.constant 0 : index
    %c0_0 = arith.constant 0 : index
    %c0_1 = arith.constant 0 : index
    %0 = vector.load %arg2[%c0, %c0_0, %c0_1] : memref<1x32x128xf32, #tpu.memory_space<vmem>>, vector<1x32x128xf32>
    %1 = vector.shape_cast %0 : vector<1x32x128xf32> to vector<32x128xf32>
    %2 = arith.truncf %1 : vector<32x128xf32> to vector<32x128xbf16>
    %c0_2 = arith.constant 0 : index
    %c0_3 = arith.constant 0 : index
    %3 = vector.load %arg3[%c0_2, %c0_3] : memref<32x32xbf16, #tpu.memory_space<vmem>>, vector<32x32xbf16>
    %cst = arith.constant dense<0.000000e+00> : vector<128x32xf32>
    %4 = tpu.matmul %2, %3, %cst {dimension_numbers = #tpu.dot_dimension_numbers<[0], [0], [1], [1], [0, 1, 1, 1], [], []>} : vector<32x128xbf16>, vector<32x32xbf16>, vector<128x32xf32> -> vector<128x32xf32>
    %c0_4 = arith.constant 0 : index
    %c0_5 = arith.constant 0 : index
    %5 = vector.load %arg4[%c0_4, %c0_5] : memref<1x32xf32, #tpu.memory_space<vmem>>, vector<1x32xf32>
    %6 = vector.broadcast %5 : vector<1x32xf32> to vector<128x32xf32>
    %7 = arith.addf %4, %6 : vector<128x32xf32>
    %c0_6 = arith.constant 0 : index
    %c0_7 = arith.constant 0 : index
    %c0_8 = arith.constant 0 : index
    %8 = vector.load %arg5[%c0_6, %c0_7, %c0_8] : memref<1x128x32xf32, #tpu.memory_space<vmem>>, vector<1x128x32xf32>
    %9 = vector.shape_cast %8 : vector<1x128x32xf32> to vector<128x32xf32>
    %10 = vector.shape_cast %7 : vector<128x32xf32> to vector<1x128x32xf32>
    tpu.vector_store %arg5[%c0_6, %c0_7, %c0_8], %10 {strides = array<i32>} : memref<1x128x32xf32, #tpu.memory_space<vmem>>, vector<1x128x32xf32>,
    return
  }
  func.func @transform_0(%arg0: i32, %arg1: i32) -> (i32, i32, i32) {
    %c0_i32 = arith.constant 0 : i32
    %c0_i32_0 = arith.constant 0 : i32
    return %arg0, %c0_i32, %arg1 : i32, i32, i32
  }
  func.func @transform_1(%arg0: i32, %arg1: i32) -> (i32, i32) {
    %c0_i32 = arith.constant 0 : i32
    %c0_i32_0 = arith.constant 0 : i32
    %c0_i32_1 = arith.constant 0 : i32
    return %c0_i32, %c0_i32_0 : i32, i32
  }
  func.func @transform_2(%arg0: i32, %arg1: i32) -> (i32, i32) {
    %c0_i32 = arith.constant 0 : i32
    %c0_i32_0 = arith.constant 0 : i32
    %c0_i32_1 = arith.constant 0 : i32
    return %c0_i32, %c0_i32_0 : i32, i32
  }
  func.func @transform_3(%arg0: i32, %arg1: i32) -> (i32, i32, i32) {
    %c0_i32 = arith.constant 0 : i32
    %c0_i32_0 = arith.constant 0 : i32
    return %arg0, %arg1, %c0_i32 : i32, i32, i32
  }
}

</mosaic_0001>

<bundles_post_ra>
// kernel: mlp_forward.1
= control target key start
LH: loop header
LB: loop body
LE: loop exit
PB: predicated region body
PF: predicated region fallthrough
CT: control target
= control target key end

     0   :  { %s642_s12 = smov 0   ;;  %s644_s13 = smov 0   ;;  %s783_s0 = inlined_call_operand.vmem [shape: f32[2,32,256], index: 0, kind: input, shape index: {}]   ;;  %s784_s1 = inlined_call_operand.vmem [shape: bf16[32,32], index: 1, kind: input, shape index: {}]   ;;  %s785_s2 = inlined_call_operand.vmem [shape: f32[1,32], index: 2, kind: input, shape index: {}]   ;;  %s786_s3 = inlined_call_operand.vmem [shape: f32[2,256,32], index: 3, kind: output, shape index: {}]  }
   0x1   :  { %s646_s14 = smov 0   ;;  %s648_s15 = smov 0  }
   0x2   :  { %s650_s16 = smov 0   ;;  %s652_s17 = smov 0  }
   0x3   :  { %s654_s18 = smov 0  }
   0x4 LB: > { %s22_s19 = sadd.s32 1, %s612_s16  ;;  %s25_s20 = sadd.s32 1, %s616_s17  ;;  %s620_s18 = sphi %s654_s18, %s13_s18   ;;  %s616_s17 = sphi %s652_s17, %s792_s17   ;;  %s612_s16 = sphi %s650_s16, %s791_s16   ;;  %s608_s15 = sphi %s648_s15, %s790_s15   ;;  %s604_s14 = sphi %s646_s14, %s789_s14   ;;  %s600_s13 = sphi %s644_s13, %s788_s13   ;;  %s596_s12 = sphi %s642_s12, %s787_s12  }
   0x5   : > { %p23_p0 = scmp.ge.s32.totalorder %s22_s19, 2  ;;  %p41_p1 = scmp.ne.s32.totalorder %s600_s13, %s596_s12 }
   0x6   : > { %p42_p2 = scmp.eq.s32.totalorder %s620_s18, 0  ;;  %s34_s24 = sadd.s32 1, %s600_s13 }
   0x7   : > { %s794_s19 = smov (%p23_p0, %s22_s19), 0  ;;  %s796_s20 = smov (!%p23_p0, %s25_s20), %s616_s17 }
   0x8   : > { %p43_p3 = por %p42_p2, %p41_p1  ;;  %p27_p4 = scmp.ge.s32.totalorder %s796_s20, 2 }
   0x9   : > { %s30_s21 = ssub.s32 %s612_s16, %s794_s19  ;;  %p473_p6 = scmp.ge.s32.totalorder %s620_s18, 4 }
   0xa   : > { %s798_s20 = smov (%p27_p4, %s796_s20), 0 }
   0xb   : > { %s29_s22 = ssub.s32 %s616_s17, %s798_s20  ;;  %143 = sbr.rel (%p473_p6) target bundleno = 26 (0x1a), region = 24 }
   0xc   : > { %s31_s23 = sor.u32 %s30_s21, %s29_s22 }
   0xd   : > { %p32_p5 = scmp.eq.s32.totalorder %s31_s23, 0 }
   0xf   : > { %s693_s25 = scalar_select %p32_p5, %s600_s13, %s34_s24  }
  0x10   : > { %146 = sbr.rel (!%p43_p3) target bundleno = 26 (0x1a), region = 28  ;;  %s148_s26 = sand.u32 (%p43_p3), 1, %s600_s13  }
  0x11   : > { %s475_s27 = sshll.u32 (%p43_p3), %s616_s17, 3  ;;  %s474_s28 = sshll.u32 (%p43_p3), %s148_s26, 5 }
  0x12   : > { %s152_s29 = sadd.s32 (%p43_p3), %s612_s16, %s475_s27  ;;  %s150_s7 = scalar_lea.vmem (%p43_p3), [#allocation2], %s474_s28 }
  0x13   : > { %s476_s30 = sshll.u32 (%p43_p3), %s152_s29, 3 }
  0x14   : > { %s154_s6 = scalar_lea.vmem (%p43_p3), %s783_s0, %s476_s30 }
  0x15   : > { %v189_v0 = vld [vmem:[%s154_s6] sm:$0xff]  ;;  %v191_v1 = vld [vmem:[%s154_s6 + $0x10] sm:$0xff] }
  0x16   : > { %v193_v2 = vld [vmem:[%s154_s6 + $0x20] sm:$0xff]  ;;  %190 = vst [vmem:[%s150_s7] sm:$0xff] %v189_v0  ;;  %v195_v3 = vld [vmem:[%s154_s6 + $0x30] sm:$0xff] }
  0x17   : > { %192 = vst [vmem:[%s150_s7 + $0x8] sm:$0xff] %v191_v1 }
  0x18   : > { %194 = vst [vmem:[%s150_s7 + $0x10] sm:$0xff] %v193_v2 }
  0x19   : > { %196 = vst [vmem:[%s150_s7 + $0x18] sm:$0xff] %v195_v3 }
  0x1a PF: > { %p477_p7 = scmp.ge.s32.totalorder %s620_s18, 1  ;;  %p201_p8 = scmp.lt.s32.totalorder %s620_s18, 5 }
  0x1c   : > { %p202_p9 = pnand %p477_p7, %p201_p8 }
  0x1d   : > { %s208_s8 = sand.u32 (!%p202_p9), 1, %s596_s12   ;;  %s479_s12 = sshll.u32 (!%p202_p9), %s604_s14, 4 }
  0x1e   : > { %205 = sbr.rel (%p202_p9) target bundleno = 467 (0x1d3), region = 66  ;;  %s478_s11 = sshll.u32 (!%p202_p9), %s208_s8, 5 }
  0x1f   : > { %s210_s23 = scalar_lea.vmem (!%p202_p9), [#allocation2], %s478_s11  ;;  %p236_p10 = scmp.lt.s32.totalorder (!%p202_p9), %s608_s15, 1 }
  0x20   : > { %p238_p11 = scmp.lt.s32.totalorder (!%p202_p9), %s479_s12, 31 }
  0x23   : > { %v501_v4 = vld [vmem:[%s784_s1 + $0x8] sm:$0xff]  ;;  %v500_v5 = vld [vmem:[%s784_s1] sm:$0xff]  ;;  %v248_v9 = vld [vmem:[%s210_s23 + $0x10] sm:$0xff]  ;;  %vm288_vm0 = vcmask 261120   ;;  %s800_s15 = smov (!%p236_p10, %s608_s15), 1  ;;  %s802_s12 = smov (!%p238_p11, %s479_s12), 31 }
  0x24   : > { %319 = vmatpush.bf16.msra.mxu0 %v501_v4  ;;  %502 = vmatpush.bf16.msra.mxu1 %v501_v4  ;;  %v246_v6 = vld [vmem:[%s210_s23] sm:$0xff]  ;;  %v247_v7 = vld [vmem:[%s210_s23 + $0x8] sm:$0xff]  ;;  %v249_v10 = vld [vmem:[%s210_s23 + $0x18] sm:$0xff]  ;;  %s480_s24 = sshll.u32 %s800_s15, 5 }
  0x25   : > { %503 = vmatpush.bf16.msra.mxu2 %v501_v4  ;;  %504 = vmatpush.bf16.msra.mxu3 %v501_v4  ;;  %v250_v8 = vpack.c.bf16 %v247_v7, %v246_v6  ;;  %v251_v11 = vpack.c.bf16 %v249_v10, %v248_v9  ;;  %s241_s26 = sadd.s32 %s480_s24, %s802_s12  ;;  %v565_v20 = vld [vmem:[%s785_s2] ss:$0 sm:$0xff] }
  0x26   : > { %s481_s27 = sshll.u32 %s241_s26, 3 }
  0x27   : > { %260 = vxpose.xlu0.c.b16.start [1/2] (short) %v250_v8, 128  ;;  %s728_s5 = scalar_lea.vmem %s786_s3, %s481_s27 }
  0x28   : > { %320 = vmatpush.bf16.msra.mxu0 %v500_v5  ;;  %505 = vmatpush.bf16.msra.mxu1 %v500_v5 }
  0x29   : > { %506 = vmatpush.bf16.msra.mxu2 %v500_v5  ;;  %507 = vmatpush.bf16.msra.mxu3 %v500_v5 }
  0x37   : > { %261 = vxpose.xlu0.c.b16.end [2/2] (short) %v251_v11, 128 }
  0xd3   : > { %v268_v12 = vpop.trf.xlu0 }
  0xd4   : > { %490 = vmatmul.msk.bf16.vlgmr.msra.gmra.mxu0 %vm288_vm0, %v268_v12 }
  0xe3   : > { %v269_v13 = vpop.trf.xlu0 }
  0xe4   : > { %491 = vmatmul.msk.bf16.gmra.mxu0 %vm288_vm0, %v269_v13 }
  0xf3   : > { %v270_v14 = vpop.trf.xlu0 }
  0xf4   : > { %492 = vmatmul.msk.bf16.vlgmr.msra.gmra.mxu1 %vm288_vm0, %v270_v14 }
 0x103   : > { %v271_v15 = vpop.trf.xlu0 }
 0x104   : > { %493 = vmatmul.msk.bf16.gmra.mxu1 %vm288_vm0, %v271_v15 }
 0x113   : > { %v272_v16 = vpop.trf.xlu0 }
 0x114   : > { %494 = vmatmul.msk.bf16.vlgmr.msra.gmra.mxu2 %vm288_vm0, %v272_v16 }
 0x123   : > { %v273_v17 = vpop.trf.xlu0 }
 0x124   : > { %495 = vmatmul.msk.bf16.gmra.mxu2 %vm288_vm0, %v273_v17 }
 0x133   : > { %v274_v18 = vpop.trf.xlu0 }
 0x134   : > { %496 = vmatmul.msk.bf16.vlgmr.msra.gmra.mxu3 %vm288_vm0, %v274_v18 }
 0x143   : > { %v275_v19 = vpop.trf.xlu0 }
 0x144   : > { %497 = vmatmul.msk.bf16.gmra.mxu3 %vm288_vm0, %v275_v19 }
 0x151   : > { %v322_v21 = vpop.f32.mrf.mxu0 }
 0x152   : > { %v323_v22 = vadd.f32 %v565_v20, %v322_v21 }
 0x154   : > { %362 = vst.msk [vmem:[%s728_s5] sm:$0xff] %vm288_vm0, %v323_v22 }
 0x159   : > { %v324_v23 = vpop.f32.mrf.mxu0 }
 0x15a   : > { %v325_v24 = vadd.f32 %v565_v20, %v324_v23 }
 0x15c   : > { %363 = vst.msk [vmem:[%s728_s5 + $0x8] sm:$0xff] %vm288_vm0, %v325_v24 }
 0x161   : > { %v327_v25 = vpop.f32.mrf.mxu0 }
 0x162   : > { %v328_v26 = vadd.f32 %v565_v20, %v327_v25 }
 0x164   : > { %364 = vst.msk [vmem:[%s728_s5 + $0x10] sm:$0xff] %vm288_vm0, %v328_v26 }
 0x169   : > { %v329_v27 = vpop.f32.mrf.mxu0 }
 0x16a   : > { %v330_v28 = vadd.f32 %v565_v20, %v329_v27 }
 0x16c   : > { %365 = vst.msk [vmem:[%s728_s5 + $0x18] sm:$0xff] %vm288_vm0, %v330_v28 }
 0x171   : > { %v332_v29 = vpop.f32.mrf.mxu1 }
 0x172   : > { %v333_v30 = vadd.f32 %v565_v20, %v332_v29 }
 0x174   : > { %366 = vst.msk [vmem:[%s728_s5 + $0x20] sm:$0xff] %vm288_vm0, %v333_v30 }
 0x179   : > { %v334_v31 = vpop.f32.mrf.mxu1 }
 0x17a   : > { %v335_v32 = vadd.f32 %v565_v20, %v334_v31 }
 0x17c   : > { %367 = vst.msk [vmem:[%s728_s5 + $0x28] sm:$0xff] %vm288_vm0, %v335_v32 }
 0x181   : > { %v337_v33 = vpop.f32.mrf.mxu1 }
 0x182   : > { %v338_v34 = vadd.f32 %v565_v20, %v337_v33 }
 0x184   : > { %368 = vst.msk [vmem:[%s728_s5 + $0x30] sm:$0xff] %vm288_vm0, %v338_v34 }
 0x189   : > { %v339_v35 = vpop.f32.mrf.mxu1 }
 0x18a   : > { %v340_v36 = vadd.f32 %v565_v20, %v339_v35 }
 0x18c   : > { %369 = vst.msk [vmem:[%s728_s5 + $0x38] sm:$0xff] %vm288_vm0, %v340_v36 }
 0x197   : > { %v342_v37 = vpop.f32.mrf.mxu2 }
 0x198   : > { %v343_v38 = vadd.f32 %v565_v20, %v342_v37 }
 0x19a   : > { %370 = vst.msk [vmem:[%s728_s5 + $0x40] sm:$0xff] %vm288_vm0, %v343_v38 }
 0x19f   : > { %v344_v39 = vpop.f32.mrf.mxu2 }
 0x1a0   : > { %v345_v40 = vadd.f32 %v565_v20, %v344_v39 }
 0x1a2   : > { %371 = vst.msk [vmem:[%s728_s5 + $0x48] sm:$0xff] %vm288_vm0, %v345_v40 }
 0x1a7   : > { %v347_v41 = vpop.f32.mrf.mxu2 }
 0x1a8   : > { %v348_v42 = vadd.f32 %v565_v20, %v347_v41 }
 0x1aa   : > { %372 = vst.msk [vmem:[%s728_s5 + $0x50] sm:$0xff] %vm288_vm0, %v348_v42 }
 0x1af   : > { %v349_v43 = vpop.f32.mrf.mxu2 }
 0x1b0   : > { %v350_v44 = vadd.f32 %v565_v20, %v349_v43 }
 0x1b2   : > { %373 = vst.msk [vmem:[%s728_s5 + $0x58] sm:$0xff] %vm288_vm0, %v350_v44 }
 0x1b7   : > { %v352_v45 = vpop.f32.mrf.mxu3 }
 0x1b8   : > { %v353_v46 = vadd.f32 %v565_v20, %v352_v45 }
 0x1ba   : > { %374 = vst.msk [vmem:[%s728_s5 + $0x60] sm:$0xff] %vm288_vm0, %v353_v46 }
 0x1bf   : > { %v354_v47 = vpop.f32.mrf.mxu3 }
 0x1c0   : > { %v355_v48 = vadd.f32 %v565_v20, %v354_v47 }
 0x1c2   : > { %375 = vst.msk [vmem:[%s728_s5 + $0x68] sm:$0xff] %vm288_vm0, %v355_v48 }
 0x1c7   : > { %v357_v49 = vpop.f32.mrf.mxu3 }
 0x1c8   : > { %v358_v50 = vadd.f32 %v565_v20, %v357_v49 }
 0x1ca   : > { %376 = vst.msk [vmem:[%s728_s5 + $0x70] sm:$0xff] %vm288_vm0, %v358_v50 }
 0x1cf   : > { %v359_v51 = vpop.f32.mrf.mxu3 }
 0x1d0   : > { %v360_v52 = vadd.f32 %v565_v20, %v359_v51 }
 0x1d2   : > { %377 = vst.msk [vmem:[%s728_s5 + $0x78] sm:$0xff] %vm288_vm0, %v360_v52 }
 0x1d3 PF: > { %s13_s18 = sadd.s32 1, %s620_s18   ;;  %s787_s12 = smov %s600_s13 }
 0x1d4   : > { %p10_p12 = scmp.ge.s32.totalorder %s13_s18, 6   ;;  %s788_s13 = smov %s693_s25 }
 0x1d5   : > { %s789_s14 = smov %s612_s16  ;;  %s790_s15 = smov %s616_s17 }
 0x1d6   : > { %s791_s16 = smov %s794_s19  ;;  %s792_s17 = smov %s798_s20 }
 0x1d7   :  { %12 = sbr.rel (!%p10_p12) target bundleno = 4 (0x4), region = 105 }

</bundles_post_ra>
